<compile_context>
chip_gen: v5e
topology: v5e:2x2
jax: 0.10.0
libtpu: 0.0.40
codegen_flags: <defaults>
</compile_context>

<pallas_src>
import jax
import jax.numpy as jnp
from jax import lax
from jax.experimental import pallas as pl
from jax.experimental.pallas import tpu as pltpu


_TARGET_BLOCK_BYTES = 4 * 1024 * 1024   # ~86% of HBM roofline per measured curve
_VMEM_LIMIT_BYTES = 32 * 1024 * 1024    # safe scoped budget on v5e/v6e/v7x
_MAX_STATIC_CHUNKS = 16                 # unroll threshold for lane-chunk loop
_MAX_NB = 16                            # cap batch rows per block (trace size)


def _largest_divisor_leq(n, limit):
    limit = max(1, min(n, limit))
    for d in range(limit, 0, -1):
        if n % d == 0:
            return d
    return 1


def _pick_tiles(n, c, hw, itemsize):
    """Choose (Nb, T): batch rows per block and HW tile (multiple of 128, or
    the full extent when HW < 128).  Sized to ~_TARGET_BLOCK_BYTES so pass 2's
    double-buffered in+out (4 blocks) stays well under the 32 MiB scoped VMEM."""
    if hw <= 128:
        t = hw
    else:
        t_budget = max(128, (_TARGET_BLOCK_BYTES // max(1, c * itemsize)) // 128 * 128)
        t = max(128, min((hw // 128) * 128, t_budget))
    nb_budget = max(1, _TARGET_BLOCK_BYTES // max(1, c * t * itemsize))
    nb_cap = min(nb_budget, _MAX_NB)
    if n > 1:
        # keep >= 2 grid steps along N so pass 1 can be megacore-sharded (v7x)
        nb_cap = min(nb_cap, n // 2)
    nb = _largest_divisor_leq(n, nb_cap)
    return nb, t


def _make_stats_kernel(*, nb, t_tile, hw, n_chunks, lc, needs_mask):
    """Pass 1: per-batch-block partial (sum, sumsq) accumulated into the
    (1, C, lc) output blocks via lane-wide VPU adds (no per-tile XLU reduce).

    NOTE: correctness requires grid axis 1 (HW tiles) to stay "arbitrary" —
    the output block for a given n is revisited and accumulated across it."""

    def stats_kernel(x_ref, sum_ref, ssq_ref):
        t = pl.program_id(1)

        @pl.when(t == 0)
        def _init():
            sum_ref[...] = jnp.zeros_like(sum_ref)
            ssq_ref[...] = jnp.zeros_like(ssq_ref)

        c = x_ref.shape[1]
        if needs_mask:
            # global lane index of each element in the current chunk
            lane = lax.broadcasted_iota(jnp.int32, (c, lc), 1) + t * t_tile
        else:
            lane = None

        def accumulate(b, start):
            xc = x_ref[b, :, pl.ds(start, lc)].astype(jnp.float32)
            if needs_mask:
                xc = jnp.where(lane + start < hw, xc, jnp.float32(0.0))
            sum_ref[...] += xc[None]
            ssq_ref[...] += (xc * xc)[None]

        for b in range(nb):  # nb is small and static
            if n_chunks <= _MAX_STATIC_CHUNKS:
                for j in range(n_chunks):
                    accumulate(b, j * lc)
            else:
                def body(j, carry, b=b):
                    accumulate(b, pl.multiple_of(j * lc, lc))
                    return carry
                lax.fori_loop(0, n_chunks, body, 0)

    return stats_kernel


def _norm_kernel(x_ref, a_ref, d_ref, o_ref):
    """Pass 2: y = x * a_c + d_c (folded affine; one mul + one add per elem)."""
    a = a_ref[...]                       # (C, 1) in compute dtype
    d = d_ref[...]
    x = x_ref[...]                       # (Nb, C, T)
    y = x.astype(a.dtype) * a[None] + d[None]
    o_ref[...] = y.astype(o_ref.dtype)


def batch_norm2d_light(x_nchw, weight, bias, eps=1e-5):
    """x_nchw: (N, C, H, W); weight, bias: (C,). Returns (N, C, H, W)."""
    n, c, h, w = x_nchw.shape
    hw = h * w
    x3 = x_nchw.reshape(n, c, hw)                  # pure view, no transpose

    itemsize = jnp.dtype(x_nchw.dtype).itemsize
    nb, t_tile = _pick_tiles(n, c, hw, itemsize)
    n_blk = n // nb
    grid_t = pl.cdiv(hw, t_tile)
    needs_mask = (hw % t_tile) != 0
    lc = min(128, t_tile)                          # lane-accumulator width
    n_chunks = max(1, t_tile // lc)

    grid = (n_blk, grid_t)
    x_spec = pl.BlockSpec((nb, c, t_tile), lambda nn, tt: (nn, 0, tt))
    acc_spec = pl.BlockSpec((1, c, lc), lambda nn, tt: (nn, 0, 0))

    # ---- Pass 1: per-batch-block partial sums (megacore-parallel over N) ----
    sums, ssqs = pl.pallas_call(
        _make_stats_kernel(nb=nb, t_tile=t_tile, hw=hw,
                           n_chunks=n_chunks, lc=lc, needs_mask=needs_mask),
        out_shape=(jax.ShapeDtypeStruct((n_blk, c, lc), jnp.float32),
                   jax.ShapeDtypeStruct((n_blk, c, lc), jnp.float32)),
        grid_spec=pltpu.PrefetchScalarGridSpec(
            num_scalar_prefetch=0,
            grid=grid,
            in_specs=[x_spec],
            out_specs=[acc_spec, acc_spec]),
        compiler_params=pltpu.CompilerParams(
            dimension_semantics=("parallel", "arbitrary"),
            vmem_limit_bytes=_VMEM_LIMIT_BYTES),
    )(x3)

    # ---- Tiny (C,)-sized finalize in plain JAX ----
    count = jnp.float32(n * hw)
    total_sum = jnp.sum(sums, axis=(0, 2))
    total_ssq = jnp.sum(ssqs, axis=(0, 2))
    mean = total_sum / count
    # Biased variance via E[x^2] - E[x]^2 (one read of x); clamp vs cancellation.
    var = jnp.maximum(total_ssq / count - mean * mean, 0.0)
    inv_std = lax.rsqrt(var + jnp.float32(eps))
    a = weight.astype(jnp.float32) * inv_std
    d = bias.astype(jnp.float32) - mean * a

    # For bf16 I/O compute pass 2 in bf16 (halves vreg pressure / VALU work on
    # v6e/v7x); otherwise keep f32.
    ad_dtype = x_nchw.dtype if x_nchw.dtype == jnp.bfloat16 else jnp.float32
    a2 = a.reshape(c, 1).astype(ad_dtype)
    d2 = d.reshape(c, 1).astype(ad_dtype)
    ch_spec = pl.BlockSpec((c, 1), lambda nn, tt: (0, 0))

    # ---- Pass 2: normalize, fully parallel over (N blocks, HW tiles) ----
    y3 = pl.pallas_call(
        _norm_kernel,
        out_shape=jax.ShapeDtypeStruct((n, c, hw), x_nchw.dtype),
        grid_spec=pltpu.PrefetchScalarGridSpec(
            num_scalar_prefetch=0,
            grid=grid,
            in_specs=[x_spec, ch_spec, ch_spec],
            out_specs=x_spec),
        compiler_params=pltpu.CompilerParams(
            dimension_semantics=("parallel", "parallel"),
            vmem_limit_bytes=_VMEM_LIMIT_BYTES),
    )(x3, a2, d2)

    return y3.reshape(n, c, h, w)


if __name__ == "__main__":
    # Deterministic synthetic parameters / input (small shapes).
    N, C, H, W = 2, 4, 16, 16
    key = jax.random.PRNGKey(0)
    kx, kw, kb = jax.random.split(key, 3)

    x = jax.random.normal(kx, (N, C, H, W), dtype=jnp.float32)
    weight = jax.random.normal(kw, (C,), dtype=jnp.float32)  # affine scale
    bias = jax.random.normal(kb, (C,), dtype=jnp.float32)    # affine shift

    out = batch_norm2d_light(x, weight, bias, eps=1e-5)
    out = jax.block_until_ready(out)

    # Pure-JAX reference (same semantics as F.batch_norm in training mode).
    mean = jnp.mean(x, axis=(0, 2, 3), keepdims=True)
    var = jnp.mean((x - mean) ** 2, axis=(0, 2, 3), keepdims=True)
    ref = (x - mean) / jnp.sqrt(var + 1e-5) * weight[None, :, None, None] \
          + bias[None, :, None, None]
    assert jnp.allclose(out, ref, atol=1e-4, rtol=1e-4), "mismatch vs reference"

    print("KERNEL_OK")
</pallas_src>

<mosaic_0001>
module attributes {stable_mosaic.version = 11 : i64} {
  func.func @stats_kernel(%arg0: i32, %arg1: i32, %arg2: memref<1x4x256xf32, #tpu.memory_space<vmem>>, %arg3: memref<1x4x128xf32, #tpu.memory_space<vmem>>, %arg4: memref<1x4x128xf32, #tpu.memory_space<vmem>>) attributes {dimension_semantics = [#tpu.dimension_semantics<parallel>, #tpu.dimension_semantics<arbitrary>], iteration_bounds = array<i64: 2, 1>, scalar_prefetch = 0 : i64, scratch_operands = 0 : i64, tpu.core_type = #tpu.core_type<tc>, window_params = [{transform_indices = @transform_0, window_bounds = array<i64: 1, 4, 256>}, {transform_indices = @transform_1, window_bounds = array<i64: 1, 4, 128>}, {transform_indices = @transform_2, window_bounds = array<i64: 1, 4, 128>}]} {
    %c0_i32 = arith.constant 0 : i32
    %0 = arith.cmpi eq, %arg1, %c0_i32 : i32
    %1 = arith.extui %0 : i1 to i32
    %c0_i32_0 = arith.constant 0 : i32
    %2 = arith.cmpi ne, %1, %c0_i32_0 : i32
    scf.if %2 {
      %cst = arith.constant 0.000000e+00 : f32
      %25 = vector.broadcast %cst : f32 to vector<1x4x128xf32>
      %c0_29 = arith.constant 0 : index
      %c0_30 = arith.constant 0 : index
      %c0_31 = arith.constant 0 : index
      %26 = vector.load %arg3[%c0_29, %c0_30, %c0_31] : memref<1x4x128xf32, #tpu.memory_space<vmem>>, vector<1x4x128xf32>
      tpu.vector_store %arg3[%c0_29, %c0_30, %c0_31], %25 {strides = array<i32>} : memref<1x4x128xf32, #tpu.memory_space<vmem>>, vector<1x4x128xf32>,
      %cst_32 = arith.constant 0.000000e+00 : f32
      %27 = vector.broadcast %cst_32 : f32 to vector<1x4x128xf32>
      %c0_33 = arith.constant 0 : index
      %c0_34 = arith.constant 0 : index
      %c0_35 = arith.constant 0 : index
      %28 = vector.load %arg4[%c0_33, %c0_34, %c0_35] : memref<1x4x128xf32, #tpu.memory_space<vmem>>, vector<1x4x128xf32>
      tpu.vector_store %arg4[%c0_33, %c0_34, %c0_35], %27 {strides = array<i32>} : memref<1x4x128xf32, #tpu.memory_space<vmem>>, vector<1x4x128xf32>,
    } else {
    }
    %c0 = arith.constant 0 : index
    %c0_1 = arith.constant 0 : index
    %c0_2 = arith.constant 0 : index
    %3 = vector.load %arg2[%c0, %c0_1, %c0_2] : memref<1x4x256xf32, #tpu.memory_space<vmem>>, vector<1x4x128xf32>
    %4 = vector.shape_cast %3 : vector<1x4x128xf32> to vector<4x128xf32>
    %c0_3 = arith.constant 0 : index
    %c0_4 = arith.constant 0 : index
    %c0_5 = arith.constant 0 : index
    %5 = vector.load %arg3[%c0_3, %c0_4, %c0_5] : memref<1x4x128xf32, #tpu.memory_space<vmem>>, vector<1x4x128xf32>
    %6 = vector.shape_cast %4 : vector<4x128xf32> to vector<1x4x128xf32>
    %7 = arith.addf %5, %6 : vector<1x4x128xf32>
    %c0_6 = arith.constant 0 : index
    %c0_7 = arith.constant 0 : index
    %c0_8 = arith.constant 0 : index
    %8 = vector.load %arg3[%c0_6, %c0_7, %c0_8] : memref<1x4x128xf32, #tpu.memory_space<vmem>>, vector<1x4x128xf32>
    tpu.vector_store %arg3[%c0_6, %c0_7, %c0_8], %7 {strides = array<i32>} : memref<1x4x128xf32, #tpu.memory_space<vmem>>, vector<1x4x128xf32>,
    %c0_9 = arith.constant 0 : index
    %c0_10 = arith.constant 0 : index
    %c0_11 = arith.constant 0 : index
    %9 = vector.load %arg4[%c0_9, %c0_10, %c0_11] : memref<1x4x128xf32, #tpu.memory_space<vmem>>, vector<1x4x128xf32>
    %10 = arith.mulf %4, %4 : vector<4x128xf32>
    %11 = vector.shape_cast %10 : vector<4x128xf32> to vector<1x4x128xf32>
    %12 = arith.addf %9, %11 : vector<1x4x128xf32>
    %c0_12 = arith.constant 0 : index
    %c0_13 = arith.constant 0 : index
    %c0_14 = arith.constant 0 : index
    %13 = vector.load %arg4[%c0_12, %c0_13, %c0_14] : memref<1x4x128xf32, #tpu.memory_space<vmem>>, vector<1x4x128xf32>
    tpu.vector_store %arg4[%c0_12, %c0_13, %c0_14], %12 {strides = array<i32>} : memref<1x4x128xf32, #tpu.memory_space<vmem>>, vector<1x4x128xf32>,
    %c0_15 = arith.constant 0 : index
    %c0_16 = arith.constant 0 : index
    %c128 = arith.constant 128 : index
    %14 = vector.load %arg2[%c0_15, %c0_16, %c128] : memref<1x4x256xf32, #tpu.memory_space<vmem>>, vector<1x4x128xf32>
    %15 = vector.shape_cast %14 : vector<1x4x128xf32> to vector<4x128xf32>
    %c0_17 = arith.constant 0 : index
    %c0_18 = arith.constant 0 : index
    %c0_19 = arith.constant 0 : index
    %16 = vector.load %arg3[%c0_17, %c0_18, %c0_19] : memref<1x4x128xf32, #tpu.memory_space<vmem>>, vector<1x4x128xf32>
    %17 = vector.shape_cast %15 : vector<4x128xf32> to vector<1x4x128xf32>
    %18 = arith.addf %16, %17 : vector<1x4x128xf32>
    %c0_20 = arith.constant 0 : index
    %c0_21 = arith.constant 0 : index
    %c0_22 = arith.constant 0 : index
    %19 = vector.load %arg3[%c0_20, %c0_21, %c0_22] : memref<1x4x128xf32, #tpu.memory_space<vmem>>, vector<1x4x128xf32>
    tpu.vector_store %arg3[%c0_20, %c0_21, %c0_22], %18 {strides = array<i32>} : memref<1x4x128xf32, #tpu.memory_space<vmem>>, vector<1x4x128xf32>,
    %c0_23 = arith.constant 0 : index
    %c0_24 = arith.constant 0 : index
    %c0_25 = arith.constant 0 : index
    %20 = vector.load %arg4[%c0_23, %c0_24, %c0_25] : memref<1x4x128xf32, #tpu.memory_space<vmem>>, vector<1x4x128xf32>
    %21 = arith.mulf %15, %15 : vector<4x128xf32>
    %22 = vector.shape_cast %21 : vector<4x128xf32> to vector<1x4x128xf32>
    %23 = arith.addf %20, %22 : vector<1x4x128xf32>
    %c0_26 = arith.constant 0 : index
    %c0_27 = arith.constant 0 : index
    %c0_28 = arith.constant 0 : index
    %24 = vector.load %arg4[%c0_26, %c0_27, %c0_28] : memref<1x4x128xf32, #tpu.memory_space<vmem>>, vector<1x4x128xf32>
    tpu.vector_store %arg4[%c0_26, %c0_27, %c0_28], %23 {strides = array<i32>} : memref<1x4x128xf32, #tpu.memory_space<vmem>>, vector<1x4x128xf32>,
    return
  }
  func.func @transform_0(%arg0: i32, %arg1: i32) -> (i32, i32, i32) {
    %c0_i32 = arith.constant 0 : i32
    %c0_i32_0 = arith.constant 0 : i32
    return %arg0, %c0_i32, %arg1 : i32, i32, i32
  }
  func.func @transform_1(%arg0: i32, %arg1: i32) -> (i32, i32, i32) {
    %c0_i32 = arith.constant 0 : i32
    %c0_i32_0 = arith.constant 0 : i32
    %c0_i32_1 = arith.constant 0 : i32
    return %arg0, %c0_i32, %c0_i32_0 : i32, i32, i32
  }
  func.func @transform_2(%arg0: i32, %arg1: i32) -> (i32, i32, i32) {
    %c0_i32 = arith.constant 0 : i32
    %c0_i32_0 = arith.constant 0 : i32
    %c0_i32_1 = arith.constant 0 : i32
    return %arg0, %c0_i32, %c0_i32_0 : i32, i32, i32
  }
}

</mosaic_0001>

<bundles_post_ra>
// kernel: tpu_custom_call.1
= control target key start
LH: loop header
LB: loop body
LE: loop exit
PB: predicated region body
PF: predicated region fallthrough
CT: control target
= control target key end

     0   :  { %8 = vsyncpa [#allocation3], 0  ;;  %s759_s0 = inlined_call_operand.hbm [shape: f32[2,4,256], index: 0, kind: input, shape index: {}]   ;;  %s760_s1 = inlined_call_operand.hbm [shape: f32[2,4,128], index: 1, kind: output, shape index: {0}]   ;;  %s761_s2 = inlined_call_operand.hbm [shape: f32[2,4,128], index: 2, kind: output, shape index: {1}]  }
   0x1   :  { %10 = vsyncpa [#allocation3 + $0x1], 0 }
   0x2   :  { %11 = vsyncpa [#allocation4], 0 }
   0x3   :  { %13 = vsyncpa [#allocation4 + $0x1], 0 }
   0x4   :  { %14 = vsyncpa [#allocation7], 0 }
   0x5   :  { %16 = vsyncpa [#allocation7 + $0x1], 0  ;;  %s609_s9 = smov 0   ;;  %s611_s10 = smov 0  }
   0x6   :  { %s613_s11 = smov 0   ;;  %s615_s12 = smov 0  }
   0x7   :  { %s617_s13 = smov 0   ;;  %s619_s14 = smov 0  }
   0x8 LB: > { %s361_s15 = sadd.s32 4294967295, %s591_s14   ;;  %s362_s16 = sadd.s32 4294967294, %s591_s14   ;;  %s591_s14 = sphi %s619_s14, %s22_s14   ;;  %s587_s13 = sphi %s617_s13, %s770_s13   ;;  %s583_s12 = sphi %s615_s12, %s769_s12   ;;  %s579_s11 = sphi %s613_s11, %s768_s11   ;;  %s575_s10 = sphi %s611_s10, %s767_s10   ;;  %s571_s9 = sphi %s609_s9, %s766_s9  }
   0x9   : > { %s34_s17 = sadd.s32 1, %s587_s13  ;;  %s43_s18 = sadd.s32 1, %s579_s11 }
   0xa   : > { %p36_p0 = scmp.ge.s32.totalorder %s34_s17, 2  ;;  %p50_p1 = scmp.ne.s32.totalorder %s579_s11, %s575_s10 }
   0xb   : > { %p51_p2 = scmp.eq.s32.totalorder %s591_s14, 0  ;;  %p56_p3 = scmp.ne.s32.totalorder %s575_s10, %s571_s9 }
   0xc   : > { %s772_s17 = smov (%p36_p0, %s34_s17), 0  ;;  %p57_p5 = scmp.eq.s32.totalorder %s361_s15, 0 }
   0xd   : > { %p650_p4 = por %p51_p2, %p50_p1  ;;  %s38_s20 = ssub.s32 %s587_s13, %s772_s17 }
   0xe   : > { %p80_p6 = scmp.eq.s32.totalorder %s361_s15, 1  ;;  %p41_p7 = scmp.eq.s32.totalorder %s38_s20, 0 }
   0xf   : > { %p656_p8 = por %p57_p5, %p56_p3  ;;  %p86_p10 = scmp.eq.s32.totalorder %s362_s16, 1 }
  0x10   : > { %p660_p9 = por %p80_p6, %p50_p1  ;;  %p364_p12 = scmp.ge.s32.totalorder %s591_s14, 2 }
  0x11   : > { %s665_s23 = scalar_select %p41_p7, %s579_s11, %s43_s18  }
  0x12   : > { %p667_p11 = por %p86_p10, %p56_p3  ;;  %p396_p13 = scmp.lt.s32.totalorder %s591_s14, 2 }
  0x13   : > { %s132_s25 = sand.u32 1, %s579_s11   ;;  %s378_s27 = sshll.u32 %s587_s13, 3 }
  0x14   : > { %s365_s26 = sshll.u32 %s132_s25, 3  ;;  %s143_s30 = scalar_lea.hbm %s759_s0, %s378_s27 }
  0x15   : > { %s136_s3 = scalar_lea.vmem [#allocation2], %s365_s26  ;;  %s145_s5 = sshll.u32 %s143_s30, 4  ;;  %s146_s5 = int_to_ptr.hbm [resolvable:$true] %s145_s5 }
  0x16   : > { %s147_s4 = sshll.u32 %s136_s3, 4  ;;  %p386_p0 = pnand %p396_p13, %p650_p4  ;;  %s148_s4 = int_to_ptr.vmem [resolvable:$true] %s147_s4 }
  0x17   : > { %p368_p1 = scmp.ge.s32.totalorder %s591_s14, 1  ;;  %p152_p2 = scmp.lt.s32.totalorder %s591_s14, 3 }
  0x18   : > { %s133_s6 = scalar_lea.sflag [#allocation3], %s132_s25 }
  0x19   : > { %388 = dma.hbm_to_vmem [thread:$0]  (!%p386_p0), %s146_s5, 128, %s148_s4, %s133_s6  }
  0x1a   : > { %p153_p3 = pnand %p368_p1, %p152_p2 }
  0x1b   : > { %s683_s7 = sand.u32 (!%p153_p3), 1, %s575_s10  }
  0x1c   : > { %156 = sbr.rel (%p153_p3) target bundleno = 72 (0x48), region = 24  ;;  %s369_s8 = sshll.u32 (!%p153_p3), %s683_s7, 3 }
  0x1d   : > { %s159_s15 = scalar_lea.sflag (!%p153_p3), [#allocation3], %s683_s7  ;;  %s162_s16 = scalar_lea.vmem (!%p153_p3), [#allocation2], %s369_s8 }
  0x21   : > { %558 = dma.done.wait (%p656_p8), %s159_s15, 128  }
  0x22   : > { %560 = vsyncadd (%p656_p8), %s159_s15, 4294967168  ;;  %s370_s18 = sshll.u32 %s683_s7, 2  ;;  %v593_v0 = vmov 0.0   ;;  %v196_v1 = vld [vmem:[%s162_s16] sm:$0xf]  ;;  %s374_s21 = sshll.u32 %s583_s12, 2 }
  0x23   : > { %s692_s19 = scalar_lea.vmem [#allocation5], %s370_s18  ;;  %s188_s20 = scalar_lea.vmem [#allocation6], %s370_s18  ;;  %v201_v2 = vmul.f32 %v196_v1, %v196_v1  ;;  %v204_v7 = vld [vmem:[%s162_s16 + $0x4] sm:$0xf] }
  0x24   : > { %194 = vst [vmem:[%s692_s19] sm:$0xf] %v593_v0  ;;  %s228_s27 = scalar_lea.hbm %s760_s1, %s374_s21  ;;  %s242_s30 = scalar_lea.hbm %s761_s2, %s374_s21  ;;  %v209_v8 = vmul.f32 %v204_v7, %v204_v7 }
  0x25   : > { %195 = vst [vmem:[%s188_s20] sm:$0xf] %v593_v0  ;;  %s230_s3 = sshll.u32 %s692_s19, 4  ;;  %s232_s4 = sshll.u32 %s228_s27, 4  ;;  %s231_s3 = int_to_ptr.vmem [resolvable:$true] %s230_s3  ;;  %s233_s4 = int_to_ptr.hbm [resolvable:$true] %s232_s4 }
  0x26   : > { %s244_s5 = sshll.u32 %s188_s20, 4  ;;  %s246_s6 = sshll.u32 %s242_s30, 4  ;;  %s706_s5 = int_to_ptr.vmem [resolvable:$true] %s244_s5  ;;  %s708_s6 = int_to_ptr.hbm [resolvable:$true] %s246_s6 }
  0x27   : > { %s213_s12 = scalar_lea.sflag [#allocation4], %s683_s7  ;;  %s491_s8 = sshra.s32 %s233_s4, 4  ;;  %s492_s8 = int_to_ptr.hbm [resolvable:$true] %s491_s8 }
  0x28   : > { %s493_s15 = scalar_lea.hbm %s492_s8, 4  ;;  %s497_s21 = scalar_lea.hbm %s760_s1, 8 }
  0x29   : > { %p494_p4 = scmp.ne.s32.totalorder %s492_s8, %s493_s15  ;;  %p498_p7 = scmp.lt.s32.totalorder %s492_s8, %s760_s1 }
  0x2a   : > { %p499_p8 = scmp.lt.s32.totalorder %s497_s21, %s493_s15 }
  0x2b   : > { %v197_v3 = vld [vmem:[%s692_s19] sm:$0xf]  ;;  %p495_p5 = pnand %p494_p4, %p660_p9 }
  0x2c   : > { %v198_v4 = vadd.f32 %v197_v3, %v196_v1  ;;  %v200_v5 = vld [vmem:[%s188_s20] sm:$0xf]  ;;  %p500_p10 = por %p499_p8, %p498_p7 }
  0x2d   : > { %v202_v6 = vadd.f32 %v201_v2, %v200_v5  ;;  %p496_p6 = pneg %p495_p5 }
  0x2e   : > { %199 = vst [vmem:[%s692_s19] sm:$0xf] %v198_v4 }
  0x2f   : > { %203 = vst [vmem:[%s188_s20] sm:$0xf] %v202_v6  ;;  %p501_p13 = pnand %p500_p10, %p496_p6 }
  0x35   : > { %v205_v9 = vld [vmem:[%s692_s19] sm:$0xf] }
  0x36   : > { %v206_v10 = vadd.f32 %v205_v9, %v204_v7  ;;  %v208_v11 = vld [vmem:[%s188_s20] sm:$0xf] }
  0x37   : > { %v210_v12 = vadd.f32 %v209_v8, %v208_v11 }
  0x38   : > { %207 = vst [vmem:[%s692_s19] sm:$0xf] %v206_v10 }
  0x39   : > { %211 = vst [vmem:[%s188_s20] sm:$0xf] %v210_v12 }
  0x3a   : > { %504 = shalt.err (!%p501_p13)
}
  0x3b   : > { %381 = dma.vmem_to_hbm [thread:$0]  (%p660_p9), %s231_s3, 64, %s233_s4, %s213_s12  }
  0x3c   : > { %s218_s19 = scalar_lea.sflag [#allocation7], %s683_s7  ;;  %s519_s20 = sshra.s32 %s708_s6, 4  ;;  %s520_s20 = int_to_ptr.hbm [resolvable:$true] %s519_s20 }
  0x3d   : > { %s521_s27 = scalar_lea.hbm %s520_s20, 4  ;;  %s525_s30 = scalar_lea.hbm %s761_s2, 8 }
  0x3e   : > { %p522_p0 = scmp.ne.s32.totalorder %s520_s20, %s521_s27  ;;  %p526_p3 = scmp.lt.s32.totalorder %s520_s20, %s761_s2 }
  0x3f   : > { %p527_p4 = scmp.lt.s32.totalorder %s525_s30, %s521_s27 }
  0x40   : > { %p523_p1 = pnand %p522_p0, %p660_p9 }
  0x41   : > { %p528_p5 = por %p527_p4, %p526_p3 }
  0x42   : > { %p524_p2 = pneg %p523_p1 }
  0x44   : > { %p529_p6 = pnand %p528_p5, %p524_p2 }
  0x46   : > { %532 = shalt.err (!%p529_p6)
}
  0x47   : > { %382 = dma.vmem_to_hbm [thread:$0]  (%p660_p9), %s706_s5, 64, %s708_s6, %s218_s19  }
  0x48 PF: > { %s258_s7 = sand.u32 1, %s571_s9   ;;  %p390_p7 = pnand %p364_p12, %p667_p11 }
  0x49   : > { %s259_s3 = scalar_lea.sflag [#allocation4], %s258_s7 }
  0x4a   : > { %p391_p8 = pneg %p390_p7 }
  0x4c   : > { %562 = dma.done.wait (%p391_p8), %s259_s3, 64  }
  0x4d   : > { %564 = vsyncadd (%p391_p8), %s259_s3, 4294967232  ;;  %s269_s4 = scalar_lea.sflag [#allocation7], %s258_s7 }
  0x4e   : > { %566 = dma.done.wait (%p391_p8), %s269_s4, 64  }
  0x4f   : > { %568 = vsyncadd (%p391_p8), %s269_s4, 4294967232  ;;  %s22_s14 = sadd.s32 1, %s591_s14   ;;  %s766_s9 = smov %s575_s10 }
  0x50   : > { %p19_p10 = scmp.ge.s32.totalorder %s22_s14, 4   ;;  %s767_s10 = smov %s579_s11 }
  0x51   : > { %s768_s11 = smov %s665_s23  ;;  %s769_s12 = smov %s587_s13 }
  0x52   : > { %s770_s13 = smov %s772_s17  ;;  %21 = sbr.rel (!%p19_p10) target bundleno = 8 (0x8), region = 90 }
  0x57   :  { %275 = vsyncpa [#allocation3], 1 }
  0x58   :  { %277 = vsyncpa [#allocation3 + $0x1], 1 }
  0x59   :  { %278 = vsyncpa [#allocation4], 1 }
  0x5a   :  { %280 = vsyncpa [#allocation4 + $0x1], 1 }
  0x5b   :  { %281 = vsyncpa [#allocation7], 1 }
  0x5c   :  { %283 = vsyncpa [#allocation7 + $0x1], 1 }

</bundles_post_ra>
